<compile_context>
chip_gen: v6e
topology: v6e:2x2x1
jax: 0.10.0
libtpu: 0.0.40
codegen_flags: <defaults>
</compile_context>

<pallas_src>
import jax
import jax.numpy as jnp
from jax import lax
from jax.experimental import pallas as pl
from jax.experimental.pallas import tpu as pltpu

_SQRT1_2 = 0.7071067811865476  # 1/sqrt(2)


def _gelu_exact(x):
    # Matches torch.nn.GELU() default (erf-based, exact).  Kept in f32.
    # TODO(synk): switch to tanh-approx GELU (EUP slot) only if profiling shows the
    # VALU slot saturating and the numerics tolerance allows it.
    return 0.5 * x * (1.0 + lax.erf(x * _SQRT1_2))


# ----------------------------------------------------------------------------
# Kernel 1: class-token cross-attention + cls MLP branch, one batch per step.
# ----------------------------------------------------------------------------
def _cls_attn_kernel(x_ref, xcls_ref, maskb_ref,
                     wq_ref, bq_ref, wkv_ref, bkv_ref, wo_ref, bo_ref,
                     w1c_ref, b1c_ref, w2c_ref, b2c_ref,
                     pool_ref, poolT_ref,
                     o_ref):
    E = x_ref.shape[-1]

    x = x_ref[0].astype(jnp.float32)                                   # [S, E]

    # Q projection; softmax scale already folded into wq/bq at prep time.
    q = jnp.dot(xcls_ref[0].astype(jnp.float32), wq_ref[...],
                preferred_element_type=jnp.float32) + bq_ref[...]      # [1, E]

    # Fused K|V projection: one MXU push.
    kv = jnp.dot(x, wkv_ref[...],
                 preferred_element_type=jnp.float32) + bkv_ref[...]    # [S, 2E]
    k = kv[:, :E]
    v = kv[:, E:]

    # scores[s, h] = sum_{d in head h} q[0, d] * k[s, d]
    #             = (k * q) @ pool, where pool[e, h] = 1 iff lane e is in head h.
    s = jnp.dot(k * q, pool_ref[...],
                preferred_element_type=jnp.float32)                    # [S, H]
    s = s + maskb_ref[0]                                               # [S, 1] key mask

    # Softmax over the key axis (rows), f32 throughout.  NOTE: fully-masked rows
    # give a uniform softmax (finite -1e30 bias) instead of PyTorch's NaN.
    m = jnp.max(s, axis=0, keepdims=True)                              # [1, H]
    e = jnp.exp(s - m)
    p = e * pl.reciprocal(jnp.sum(e, axis=0, keepdims=True), approx=True)  # [S, H]

    # Broadcast per-head weights back to E lanes and contract over keys.
    pf = jnp.dot(p, poolT_ref[...],
                 preferred_element_type=jnp.float32)                   # [S, E]
    ctx = jnp.sum(pf * v, axis=0, keepdims=True)                       # [1, E]
    attn = jnp.dot(ctx, wo_ref[...],
                   preferred_element_type=jnp.float32) + bo_ref[...]   # [1, E]

    # cls branch:  gelu(fc1_cls) -> (dropout = identity) -> fc2
    clsh = _gelu_exact(jnp.dot(attn, w1c_ref[...],
                               preferred_element_type=jnp.float32) + b1c_ref[...])
    cls_out = jnp.dot(clsh, w2c_ref[...],
                      preferred_element_type=jnp.float32) + b2c_ref[...]  # [1, E]
    o_ref[0] = cls_out.astype(o_ref.dtype)


# ----------------------------------------------------------------------------
# Kernel 2: heavy main-branch MLP on a (batch, seq-tile) grid.
#   out = fc2( gelu( fc1(x + cls) ) ) + b2 + x
# ----------------------------------------------------------------------------
def _mlp_kernel(x_ref, cls_ref, w1_ref, b1_ref, w2_ref, b2_ref, o_ref):
    x = x_ref[0].astype(jnp.float32)                                   # [TS, E]
    cls = cls_ref[0].astype(jnp.float32)                               # [1, E]
    xn = x + cls                                                       # in-register broadcast
    h = jnp.dot(xn.astype(w1_ref.dtype), w1_ref[...],
                preferred_element_type=jnp.float32) + b1_ref[...]      # [TS, hidden]
    h = _gelu_exact(h)                                                 # f32 elementwise
    out = jnp.dot(h.astype(w2_ref.dtype), w2_ref[...],
                  preferred_element_type=jnp.float32) + b2_ref[...] + x
    o_ref[0] = out.astype(o_ref.dtype)


# ----------------------------------------------------------------------------
# One-time parameter preparation (hoisted out of the per-call forward).
# ----------------------------------------------------------------------------
def prepare_block_params(params, num_heads, matmul_dtype=jnp.float32):
    E = params["wq"].shape[0]
    hidden = params["w1"].shape[0]
    dh = E // num_heads
    scale = 1.0 / (dh ** 0.5)

    # Constant 0/1 head-pooling matrices.
    pool = (jnp.arange(E)[:, None] // dh
            == jnp.arange(num_heads)[None, :]).astype(jnp.float32)     # [E, H]

    return {
        # attention weights (f32; softmax scale folded into the Q projection)
        "wq": (params["wq"].T * scale).astype(jnp.float32),
        "bq": (params["bq"] * scale).reshape(1, E).astype(jnp.float32),
        "wkv": jnp.concatenate([params["wk"].T, params["wv"].T],
                               axis=1).astype(jnp.float32),            # [E, 2E]
        "bkv": jnp.concatenate([params["bk"], params["bv"]]
                               ).reshape(1, 2 * E).astype(jnp.float32),
        "wo": params["wo"].T.astype(jnp.float32),
        "bo": params["bo"].reshape(1, E).astype(jnp.float32),
        # cls-branch MLP (f32)
        "w1c": params["w1c"].T.astype(jnp.float32),
        "b1c": params["b1c"].reshape(1, hidden).astype(jnp.float32),
        "w2c": params["w2"].T.astype(jnp.float32),      # forward reuses fc2
        "b2c": params["b2"].reshape(1, E).astype(jnp.float32),
        # heavy main-branch MLP (optionally bf16 matmul inputs, f32 biases)
        "w1": params["w1"].T.astype(matmul_dtype),
        "b1": params["b1"].reshape(1, hidden).astype(jnp.float32),
        "w2": params["w2"].T.astype(matmul_dtype),
        "b2": params["b2"].reshape(1, E).astype(jnp.float32),
        "pool": pool,
        "poolT": pool.T,
    }


def _choose_seq_tile(S, E, itemsize):
    """Largest no-padding seq tile: whole S if it fits, else a divisor of S."""
    max_rows = max(512, min(4096, (2 << 20) // max(1, E * itemsize)))
    if S <= max_rows:
        return S
    for align in (128, 16, 8):
        start = max_rows - (max_rows % align)
        for t in range(start, align - 1, -align):
            if S % t == 0:
                return t
    return S  # fallback: stream the whole sequence (never pad)


def _vmem_limit(estimate_bytes):
    # Explicit scoped-VMEM request (perf review); clamp to v7x's 64 MiB physical.
    return int(min(64 * 1024 * 1024, max(int(estimate_bytes) + (4 << 20), 8 << 20)))


# ----------------------------------------------------------------------------
# Forward wrapper
# ----------------------------------------------------------------------------
def block_forward(x, x_cls, prep, key_padding_mask=None):
    """Pallas forward of Block.

    x:      [B, S, E]   (f32 or bf16 -- bf16 streams half the HBM bytes)
    x_cls:  [B, 1, E]
    prep:   output of prepare_block_params (one-time weight prep)
    key_padding_mask: optional [B, S] bool (True = ignore that key).
    """
    B, S, E = x.shape
    hidden = prep["w1"].shape[1]

    if key_padding_mask is None:
        maskb = jnp.zeros((B, S, 1), jnp.float32)
    else:
        # Additive bias: -1e30 where masked (finite -> fully-masked rows give a
        # uniform softmax instead of PyTorch's NaN; intentional divergence).
        maskb = jnp.where(key_padding_mask, -1e30,
                          0.0).astype(jnp.float32).reshape(B, S, 1)

    vmem = pl.BlockSpec(memory_space=pltpu.MemorySpace.VMEM)

    # ---- Kernel 1: per-batch class-token cross-attention + cls MLP branch ----
    cls_weights = (prep["wq"], prep["bq"], prep["wkv"], prep["bkv"],
                   prep["wo"], prep["bo"], prep["w1c"], prep["b1c"],
                   prep["w2c"], prep["b2c"], prep["pool"], prep["poolT"])
    clsw_bytes = sum(int(a.size) * a.dtype.itemsize for a in cls_weights)
    cls_vmem = _vmem_limit(clsw_bytes
                           + 2 * S * E * (x.dtype.itemsize + 4)
                           + 8 * S * E * 4)

    cls_out = pl.pallas_call(
        _cls_attn_kernel,
        out_shape=jax.ShapeDtypeStruct((B, 1, E), jnp.float32),
        grid=(B,),
        in_specs=[pl.BlockSpec((1, S, E), lambda b: (b, 0, 0)),
                  pl.BlockSpec((1, 1, E), lambda b: (b, 0, 0)),
                  pl.BlockSpec((1, S, 1), lambda b: (b, 0, 0))]
                 + [vmem] * len(cls_weights),
        out_specs=pl.BlockSpec((1, 1, E), lambda b: (b, 0, 0)),
        compiler_params=pltpu.CompilerParams(
            dimension_semantics=("parallel",),
            vmem_limit_bytes=cls_vmem),
    )(x, x_cls, maskb, *cls_weights)

    # ---- Kernel 2: heavy main-branch MLP, grid (batch, seq-tile) ----
    TS = _choose_seq_tile(S, E, x.dtype.itemsize)
    mlp_weights = (prep["w1"], prep["b1"], prep["w2"], prep["b2"])
    mlpw_bytes = sum(int(a.size) * a.dtype.itemsize for a in mlp_weights)
    mlp_vmem = _vmem_limit(mlpw_bytes
                           + 4 * TS * E * x.dtype.itemsize
                           + 8 * TS * max(E, hidden) * 4)

    out = pl.pallas_call(
        _mlp_kernel,
        out_shape=jax.ShapeDtypeStruct((B, S, E), x.dtype),
        grid=(B, S // TS),
        in_specs=[pl.BlockSpec((1, TS, E), lambda b, t: (b, t, 0)),   # x rows
                  pl.BlockSpec((1, 1, E), lambda b, t: (b, 0, 0)),    # cls (per batch)
                  vmem, vmem, vmem, vmem],                            # weights, 1 copy
        out_specs=pl.BlockSpec((1, TS, E), lambda b, t: (b, t, 0)),
        compiler_params=pltpu.CompilerParams(
            dimension_semantics=("parallel", "parallel"),
            vmem_limit_bytes=mlp_vmem),
    )(x, cls_out, *mlp_weights)

    return out


# ----------------------------------------------------------------------------
# Pure-JAX reference mirroring the PyTorch forward (eval mode).
# ----------------------------------------------------------------------------
def block_reference(x, x_cls, params, num_heads, key_padding_mask=None):
    B, S, E = x.shape
    Tq = x_cls.shape[1]
    H = num_heads
    dh = E // H
    scale = 1.0 / (dh ** 0.5)
    if key_padding_mask is None:
        mb = jnp.zeros((B, S), jnp.float32)
    else:
        mb = jnp.where(key_padding_mask, -1e30, 0.0).astype(jnp.float32)

    q = x_cls @ params["wq"].T + params["bq"]
    k = x @ params["wk"].T + params["bk"]
    v = x @ params["wv"].T + params["bv"]
    qh = q.reshape(B, Tq, H, dh)
    kh = k.reshape(B, S, H, dh)
    vh = v.reshape(B, S, H, dh)
    s = jnp.einsum("bqhd,bkhd->bhqk", qh, kh) * scale + mb[:, None, None, :]
    p = jax.nn.softmax(s, axis=-1)
    ctx = jnp.einsum("bhqk,bkhd->bqhd", p, vh).reshape(B, Tq, E)
    attn_out = ctx @ params["wo"].T + params["bo"]

    cls = _gelu_exact(attn_out @ params["w1c"].T + params["b1c"])
    cls = cls @ params["w2"].T + params["b2"]        # forward uses fc2 (not fc2_cls)

    xn = x + cls
    h = _gelu_exact(xn @ params["w1"].T + params["b1"])
    out = h @ params["w2"].T + params["b2"] + x
    return out


def init_params(key, embed_dim, hidden):
    """Deterministic synthetic parameters with the same shapes as the PyTorch module."""
    ks = jax.random.split(key, 12)
    E, Hd = embed_dim, hidden
    n = lambda k, shp: (0.1 * jax.random.normal(k, shp, jnp.float32))
    return {
        # nn.MultiheadAttention: in_proj (3E, E) split into q/k/v, out_proj (E, E)
        "wq": n(ks[0], (E, E)), "bq": n(ks[1], (E,)),
        "wk": n(ks[2], (E, E)), "bk": n(ks[3], (E,)),
        "wv": n(ks[4], (E, E)), "bv": n(ks[5], (E,)),
        "wo": n(ks[6], (E, E)), "bo": n(ks[7], (E,)),
        # fc1_cls, fc1: (hidden, E); fc2: (E, hidden)
        "w1c": n(ks[8], (Hd, E)), "b1c": n(ks[9], (Hd,)),
        "w1": n(ks[10], (Hd, E)), "b1": n(ks[11], (Hd,)),
        "w2": n(jax.random.fold_in(key, 100), (E, Hd)),
        "b2": n(jax.random.fold_in(key, 101), (E,)),
        # fc2_cls exists in __init__ but is never used in forward.
    }


if __name__ == "__main__":
    B, S, E, H, HIDDEN = 2, 8, 32, 4, 64  # embed_dim=32, num_heads=4, hidden=64

    key = jax.random.PRNGKey(0)
    kx, kc, kp = jax.random.split(key, 3)
    x = jax.random.normal(kx, (B, S, E), jnp.float32)
    x_cls = jax.random.normal(kc, (B, 1, E), jnp.float32)
    params = init_params(kp, E, HIDDEN)

    # One-time weight preparation (hoisted out of the per-call forward path).
    prep = prepare_block_params(params, num_heads=H)
    fwd = jax.jit(block_forward)

    # 1) f32, no mask: strict check against the PyTorch-equivalent reference.
    out = jax.block_until_ready(fwd(x, x_cls, prep))
    ref = jax.block_until_ready(block_reference(x, x_cls, params, num_heads=H))
    assert out.shape == (B, S, E)
    assert jnp.allclose(out, ref, atol=5e-3, rtol=5e-3), (
        f"max abs diff {jnp.max(jnp.abs(out - ref))}")

    # 2) key_padding_mask path (mask last two keys of batch 1).
    mask = jnp.zeros((B, S), bool).at[1, -2:].set(True)
    out_m = jax.block_until_ready(fwd(x, x_cls, prep, key_padding_mask=mask))
    ref_m = block_reference(x, x_cls, params, num_heads=H, key_padding_mask=mask)
    assert jnp.allclose(out_m, ref_m, atol=5e-3, rtol=5e-3), (
        f"masked max abs diff {jnp.max(jnp.abs(out_m - ref_m))}")

    # 3) bf16 activation streaming + bf16 MLP matmul inputs (v6e/v7x path),
    #    f32 accumulation in-kernel; loose check against the f32 reference.
    prep_bf = prepare_block_params(params, num_heads=H, matmul_dtype=jnp.bfloat16)
    out_bf = jax.block_until_ready(
        fwd(x.astype(jnp.bfloat16), x_cls.astype(jnp.bfloat16), prep_bf))
    assert out_bf.dtype == jnp.bfloat16
    assert jnp.allclose(out_bf.astype(jnp.float32), ref, atol=1e-1, rtol=1e-1), (
        f"bf16 max abs diff {jnp.max(jnp.abs(out_bf.astype(jnp.float32) - ref))}")

    print("KERNEL_OK")
</pallas_src>

<mosaic_0001>
module attributes {stable_mosaic.version = 11 : i64} {
  func.func @_cls_attn_kernel(%arg0: i32, %arg1: memref<1x8x32xf32, #tpu.memory_space<vmem>>, %arg2: memref<1x1x32xf32, #tpu.memory_space<vmem>>, %arg3: memref<1x8x1xf32, #tpu.memory_space<vmem>>, %arg4: memref<32x32xf32, #tpu.memory_space<vmem>>, %arg5: memref<1x32xf32, #tpu.memory_space<vmem>>, %arg6: memref<32x64xf32, #tpu.memory_space<vmem>>, %arg7: memref<1x64xf32, #tpu.memory_space<vmem>>, %arg8: memref<32x32xf32, #tpu.memory_space<vmem>>, %arg9: memref<1x32xf32, #tpu.memory_space<vmem>>, %arg10: memref<32x64xf32, #tpu.memory_space<vmem>>, %arg11: memref<1x64xf32, #tpu.memory_space<vmem>>, %arg12: memref<64x32xf32, #tpu.memory_space<vmem>>, %arg13: memref<1x32xf32, #tpu.memory_space<vmem>>, %arg14: memref<32x4xf32, #tpu.memory_space<vmem>>, %arg15: memref<4x32xf32, #tpu.memory_space<vmem>>, %arg16: memref<1x1x32xf32, #tpu.memory_space<vmem>>) attributes {dimension_semantics = [#tpu.dimension_semantics<parallel>], iteration_bounds = array<i64: 2>, scalar_prefetch = 0 : i64, scratch_operands = 0 : i64, tpu.core_type = #tpu.core_type<tc>, window_params = [{transform_indices = @transform_0, window_bounds = array<i64: 1, 8, 32>}, {transform_indices = @transform_1, window_bounds = array<i64: 1, 1, 32>}, {transform_indices = @transform_2, window_bounds = array<i64: 1, 8, 1>}, {pipeline_mode = #tpu.pipeline_mode<synchronous>, transform_indices = @transform_3, window_bounds = array<i64: 32, 32>}, {pipeline_mode = #tpu.pipeline_mode<synchronous>, transform_indices = @transform_4, window_bounds = array<i64: 1, 32>}, {pipeline_mode = #tpu.pipeline_mode<synchronous>, transform_indices = @transform_5, window_bounds = array<i64: 32, 64>}, {pipeline_mode = #tpu.pipeline_mode<synchronous>, transform_indices = @transform_6, window_bounds = array<i64: 1, 64>}, {pipeline_mode = #tpu.pipeline_mode<synchronous>, transform_indices = @transform_7, window_bounds = array<i64: 32, 32>}, {pipeline_mode = #tpu.pipeline_mode<synchronous>, transform_indices = @transform_8, window_bounds = array<i64: 1, 32>}, {pipeline_mode = #tpu.pipeline_mode<synchronous>, transform_indices = @transform_9, window_bounds = array<i64: 32, 64>}, {pipeline_mode = #tpu.pipeline_mode<synchronous>, transform_indices = @transform_10, window_bounds = array<i64: 1, 64>}, {pipeline_mode = #tpu.pipeline_mode<synchronous>, transform_indices = @transform_11, window_bounds = array<i64: 64, 32>}, {pipeline_mode = #tpu.pipeline_mode<synchronous>, transform_indices = @transform_12, window_bounds = array<i64: 1, 32>}, {pipeline_mode = #tpu.pipeline_mode<synchronous>, transform_indices = @transform_13, window_bounds = array<i64: 32, 4>}, {pipeline_mode = #tpu.pipeline_mode<synchronous>, transform_indices = @transform_14, window_bounds = array<i64: 4, 32>}, {transform_indices = @transform_15, window_bounds = array<i64: 1, 1, 32>}]} {
    %c0 = arith.constant 0 : index
    %c0_0 = arith.constant 0 : index
    %c0_1 = arith.constant 0 : index
    %0 = vector.load %arg1[%c0, %c0_0, %c0_1] : memref<1x8x32xf32, #tpu.memory_space<vmem>>, vector<1x8x32xf32>
    %1 = vector.shape_cast %0 : vector<1x8x32xf32> to vector<8x32xf32>
    %c0_2 = arith.constant 0 : index
    %c0_3 = arith.constant 0 : index
    %c0_4 = arith.constant 0 : index
    %2 = vector.load %arg2[%c0_2, %c0_3, %c0_4] : memref<1x1x32xf32, #tpu.memory_space<vmem>>, vector<1x1x32xf32>
    %3 = vector.shape_cast %2 : vector<1x1x32xf32> to vector<1x32xf32>
    %c0_5 = arith.constant 0 : index
    %c0_6 = arith.constant 0 : index
    %4 = vector.load %arg4[%c0_5, %c0_6] : memref<32x32xf32, #tpu.memory_space<vmem>>, vector<32x32xf32>
    %cst = arith.constant dense<0.000000e+00> : vector<1x32xf32>
    %5 = tpu.matmul %3, %4, %cst {dimension_numbers = #tpu.dot_dimension_numbers<[1], [0], [0], [1], [0, 0, 1, 1], [], []>} : vector<1x32xf32>, vector<32x32xf32>, vector<1x32xf32> -> vector<1x32xf32>
    %c0_7 = arith.constant 0 : index
    %c0_8 = arith.constant 0 : index
    %6 = vector.load %arg5[%c0_7, %c0_8] : memref<1x32xf32, #tpu.memory_space<vmem>>, vector<1x32xf32>
    %7 = arith.addf %5, %6 : vector<1x32xf32>
    %c0_9 = arith.constant 0 : index
    %c0_10 = arith.constant 0 : index
    %8 = vector.load %arg6[%c0_9, %c0_10] : memref<32x64xf32, #tpu.memory_space<vmem>>, vector<32x64xf32>
    %cst_11 = arith.constant dense<0.000000e+00> : vector<8x64xf32>
    %9 = tpu.matmul %1, %8, %cst_11 {dimension_numbers = #tpu.dot_dimension_numbers<[1], [0], [0], [1], [0, 0, 1, 1], [], []>} : vector<8x32xf32>, vector<32x64xf32>, vector<8x64xf32> -> vector<8x64xf32>
    %c0_12 = arith.constant 0 : index
    %c0_13 = arith.constant 0 : index
    %10 = vector.load %arg7[%c0_12, %c0_13] : memref<1x64xf32, #tpu.memory_space<vmem>>, vector<1x64xf32>
    %11 = vector.broadcast %10 : vector<1x64xf32> to vector<8x64xf32>
    %12 = arith.addf %9, %11 : vector<8x64xf32>
    %13 = vector.extract_strided_slice %12 {offsets = [0, 0], sizes = [8, 32], strides = [1, 1]} : vector<8x64xf32> to vector<8x32xf32>
    %14 = vector.extract_strided_slice %12 {offsets = [0, 32], sizes = [8, 32], strides = [1, 1]} : vector<8x64xf32> to vector<8x32xf32>
    %15 = vector.broadcast %7 : vector<1x32xf32> to vector<8x32xf32>
    %16 = arith.mulf %13, %15 : vector<8x32xf32>
    %c0_14 = arith.constant 0 : index
    %c0_15 = arith.constant 0 : index
    %17 = vector.load %arg14[%c0_14, %c0_15] : memref<32x4xf32, #tpu.memory_space<vmem>>, vector<32x4xf32>
    %cst_16 = arith.constant dense<0.000000e+00> : vector<8x4xf32>
    %18 = tpu.matmul %16, %17, %cst_16 {dimension_numbers = #tpu.dot_dimension_numbers<[1], [0], [0], [1], [0, 0, 1, 1], [], []>} : vector<8x32xf32>, vector<32x4xf32>, vector<8x4xf32> -> vector<8x4xf32>
    %c0_17 = arith.constant 0 : index
    %c0_18 = arith.constant 0 : index
    %c0_19 = arith.constant 0 : index
    %19 = vector.load %arg3[%c0_17, %c0_18, %c0_19] : memref<1x8x1xf32, #tpu.memory_space<vmem>>, vector<1x8x1xf32>
    %20 = vector.shape_cast %19 : vector<1x8x1xf32> to vector<8x1xf32>
    %21 = vector.broadcast %20 : vector<8x1xf32> to vector<8x4xf32>
    %22 = arith.addf %18, %21 : vector<8x4xf32>
    %cst_20 = arith.constant dense<0xFF800000> : vector<4xf32>
    %23 = vector.multi_reduction <maximumf>, %22, %cst_20 [0] : vector<8x4xf32> to vector<4xf32>
    %24 = vector.shape_cast %23 : vector<4xf32> to vector<1x4xf32>
    %25 = vector.broadcast %24 : vector<1x4xf32> to vector<8x4xf32>
    %26 = arith.subf %22, %25 : vector<8x4xf32>
    %27 = math.exp %26 : vector<8x4xf32>
    %cst_21 = arith.constant dense<0.000000e+00> : vector<4xf32>
    %28 = vector.multi_reduction <add>, %27, %cst_21 [0] : vector<8x4xf32> to vector<4xf32>
    %29 = vector.shape_cast %28 : vector<4xf32> to vector<1x4xf32>
    %30 = tpu.reciprocal %29 {approx = true} : vector<1x4xf32> -> vector<1x4xf32>
    %31 = vector.broadcast %30 : vector<1x4xf32> to vector<8x4xf32>
    %32 = arith.mulf %27, %31 : vector<8x4xf32>
    %c0_22 = arith.constant 0 : index
    %c0_23 = arith.constant 0 : index
    %33 = vector.load %arg15[%c0_22, %c0_23] : memref<4x32xf32, #tpu.memory_space<vmem>>, vector<4x32xf32>
    %cst_24 = arith.constant dense<0.000000e+00> : vector<8x32xf32>
    %34 = tpu.matmul %32, %33, %cst_24 {dimension_numbers = #tpu.dot_dimension_numbers<[1], [0], [0], [1], [0, 0, 1, 1], [], []>} : vector<8x4xf32>, vector<4x32xf32>, vector<8x32xf32> -> vector<8x32xf32>
    %35 = arith.mulf %34, %14 : vector<8x32xf32>
    %cst_25 = arith.constant dense<0.000000e+00> : vector<32xf32>
    %36 = vector.multi_reduction <add>, %35, %cst_25 [0] : vector<8x32xf32> to vector<32xf32>
    %37 = vector.shape_cast %36 : vector<32xf32> to vector<1x32xf32>
    %c0_26 = arith.constant 0 : index
    %c0_27 = arith.constant 0 : index
    %38 = vector.load %arg8[%c0_26, %c0_27] : memref<32x32xf32, #tpu.memory_space<vmem>>, vector<32x32xf32>
    %cst_28 = arith.constant dense<0.000000e+00> : vector<1x32xf32>
    %39 = tpu.matmul %37, %38, %cst_28 {dimension_numbers = #tpu.dot_dimension_numbers<[1], [0], [0], [1], [0, 0, 1, 1], [], []>} : vector<1x32xf32>, vector<32x32xf32>, vector<1x32xf32> -> vector<1x32xf32>
    %c0_29 = arith.constant 0 : index
    %c0_30 = arith.constant 0 : index
    %40 = vector.load %arg9[%c0_29, %c0_30] : memref<1x32xf32, #tpu.memory_space<vmem>>, vector<1x32xf32>
    %41 = arith.addf %39, %40 : vector<1x32xf32>
    %c0_31 = arith.constant 0 : index
    %c0_32 = arith.constant 0 : index
    %42 = vector.load %arg10[%c0_31, %c0_32] : memref<32x64xf32, #tpu.memory_space<vmem>>, vector<32x64xf32>
    %cst_33 = arith.constant dense<0.000000e+00> : vector<1x64xf32>
    %43 = tpu.matmul %41, %42, %cst_33 {dimension_numbers = #tpu.dot_dimension_numbers<[1], [0], [0], [1], [0, 0, 1, 1], [], []>} : vector<1x32xf32>, vector<32x64xf32>, vector<1x64xf32> -> vector<1x64xf32>
    %c0_34 = arith.constant 0 : index
    %c0_35 = arith.constant 0 : index
    %44 = vector.load %arg11[%c0_34, %c0_35] : memref<1x64xf32, #tpu.memory_space<vmem>>, vector<1x64xf32>
    %45 = arith.addf %43, %44 : vector<1x64xf32>
    %cst_36 = arith.constant 5.000000e-01 : f32
    %46 = vector.broadcast %cst_36 : f32 to vector<1x64xf32>
    %47 = arith.mulf %46, %45 : vector<1x64xf32>
    %cst_37 = arith.constant 0.707106769 : f32
    %48 = vector.broadcast %cst_37 : f32 to vector<1x64xf32>
    %49 = arith.mulf %45, %48 : vector<1x64xf32>
    %50 = math.erf %49 : vector<1x64xf32>
    %cst_38 = arith.constant 1.000000e+00 : f32
    %51 = vector.broadcast %cst_38 : f32 to vector<1x64xf32>
    %52 = arith.addf %51, %50 : vector<1x64xf32>
    %53 = arith.mulf %47, %52 : vector<1x64xf32>
    %c0_39 = arith.constant 0 : index
    %c0_40 = arith.constant 0 : index
    %54 = vector.load %arg12[%c0_39, %c0_40] : memref<64x32xf32, #tpu.memory_space<vmem>>, vector<64x32xf32>
    %cst_41 = arith.constant dense<0.000000e+00> : vector<1x32xf32>
    %55 = tpu.matmul %53, %54, %cst_41 {dimension_numbers = #tpu.dot_dimension_numbers<[1], [0], [0], [1], [0, 0, 1, 1], [], []>} : vector<1x64xf32>, vector<64x32xf32>, vector<1x32xf32> -> vector<1x32xf32>
    %c0_42 = arith.constant 0 : index
    %c0_43 = arith.constant 0 : index
    %56 = vector.load %arg13[%c0_42, %c0_43] : memref<1x32xf32, #tpu.memory_space<vmem>>, vector<1x32xf32>
    %57 = arith.addf %55, %56 : vector<1x32xf32>
    %c0_44 = arith.constant 0 : index
    %c0_45 = arith.constant 0 : index
    %c0_46 = arith.constant 0 : index
    %58 = vector.load %arg16[%c0_44, %c0_45, %c0_46] : memref<1x1x32xf32, #tpu.memory_space<vmem>>, vector<1x1x32xf32>
    %59 = vector.shape_cast %58 : vector<1x1x32xf32> to vector<1x32xf32>
    %60 = vector.shape_cast %57 : vector<1x32xf32> to vector<1x1x32xf32>
    tpu.vector_store %arg16[%c0_44, %c0_45, %c0_46], %60 {strides = array<i32>} : memref<1x1x32xf32, #tpu.memory_space<vmem>>, vector<1x1x32xf32>,
    return
  }
  func.func @transform_0(%arg0: i32) -> (i32, i32, i32) {
    %c0_i32 = arith.constant 0 : i32
    %c0_i32_0 = arith.constant 0 : i32
    %c0_i32_1 = arith.constant 0 : i32
    return %arg0, %c0_i32, %c0_i32_0 : i32, i32, i32
  }
  func.func @transform_1(%arg0: i32) -> (i32, i32, i32) {
    %c0_i32 = arith.constant 0 : i32
    %c0_i32_0 = arith.constant 0 : i32
    %c0_i32_1 = arith.constant 0 : i32
    return %arg0, %c0_i32, %c0_i32_0 : i32, i32, i32
  }
  func.func @transform_2(%arg0: i32) -> (i32, i32, i32) {
    %c0_i32 = arith.constant 0 : i32
    %c0_i32_0 = arith.constant 0 : i32
    %c0_i32_1 = arith.constant 0 : i32
    return %arg0, %c0_i32, %c0_i32_0 : i32, i32, i32
  }
  func.func @transform_3(%arg0: i32) -> (i32, i32) {
    %c0_i32 = arith.constant 0 : i32
    %c0_i32_0 = arith.constant 0 : i32
    %c0_i32_1 = arith.constant 0 : i32
    return %c0_i32, %c0_i32_0 : i32, i32
  }
  func.func @transform_4(%arg0: i32) -> (i32, i32) {
    %c0_i32 = arith.constant 0 : i32
    %c0_i32_0 = arith.constant 0 : i32
    %c0_i32_1 = arith.constant 0 : i32
    return %c0_i32, %c0_i32_0 : i32, i32
  }
  func.func @transform_5(%arg0: i32) -> (i32, i32) {
    %c0_i32 = arith.constant 0 : i32
    %c0_i32_0 = arith.constant 0 : i32
    %c0_i32_1 = arith.constant 0 : i32
    return %c0_i32, %c0_i32_0 : i32, i32
  }
  func.func @transform_6(%arg0: i32) -> (i32, i32) {
    %c0_i32 = arith.constant 0 : i32
    %c0_i32_0 = arith.constant 0 : i32
    %c0_i32_1 = arith.constant 0 : i32
    return %c0_i32, %c0_i32_0 : i32, i32
  }
  func.func @transform_7(%arg0: i32) -> (i32, i32) {
    %c0_i32 = arith.constant 0 : i32
    %c0_i32_0 = arith.constant 0 : i32
    %c0_i32_1 = arith.constant 0 : i32
    return %c0_i32, %c0_i32_0 : i32, i32
  }
  func.func @transform_8(%arg0: i32) -> (i32, i32) {
    %c0_i32 = arith.constant 0 : i32
    %c0_i32_0 = arith.constant 0 : i32
    %c0_i32_1 = arith.constant 0 : i32
    return %c0_i32, %c0_i32_0 : i32, i32
  }
  func.func @transform_9(%arg0: i32) -> (i32, i32) {
    %c0_i32 = arith.constant 0 : i32
    %c0_i32_0 = arith.constant 0 : i32
    %c0_i32_1 = arith.constant 0 : i32
    return %c0_i32, %c0_i32_0 : i32, i32
  }
  func.func @transform_10(%arg0: i32) -> (i32, i32) {
    %c0_i32 = arith.constant 0 : i32
    %c0_i32_0 = arith.constant 0 : i32
    %c0_i32_1 = arith.constant 0 : i32
    return %c0_i32, %c0_i32_0 : i32, i32
  }
  func.func @transform_11(%arg0: i32) -> (i32, i32) {
    %c0_i32 = arith.constant 0 : i32
    %c0_i32_0 = arith.constant 0 : i32
    %c0_i32_1 = arith.constant 0 : i32
    return %c0_i32, %c0_i32_0 : i32, i32
  }
  func.func @transform_12(%arg0: i32) -> (i32, i32) {
    %c0_i32 = arith.constant 0 : i32
    %c0_i32_0 = arith.constant 0 : i32
    %c0_i32_1 = arith.constant 0 : i32
    return %c0_i32, %c0_i32_0 : i32, i32
  }
  func.func @transform_13(%arg0: i32) -> (i32, i32) {
    %c0_i32 = arith.constant 0 : i32
    %c0_i32_0 = arith.constant 0 : i32
    %c0_i32_1 = arith.constant 0 : i32
    return %c0_i32, %c0_i32_0 : i32, i32
  }
  func.func @transform_14(%arg0: i32) -> (i32, i32) {
    %c0_i32 = arith.constant 0 : i32
    %c0_i32_0 = arith.constant 0 : i32
    %c0_i32_1 = arith.constant 0 : i32
    return %c0_i32, %c0_i32_0 : i32, i32
  }
  func.func @transform_15(%arg0: i32) -> (i32, i32, i32) {
    %c0_i32 = arith.constant 0 : i32
    %c0_i32_0 = arith.constant 0 : i32
    %c0_i32_1 = arith.constant 0 : i32
    return %arg0, %c0_i32, %c0_i32_0 : i32, i32, i32
  }
}

module attributes {stable_mosaic.version = 11 : i64} {
  func.func @_mlp_kernel(%arg0: i32, %arg1: i32, %arg2: memref<1x8x32xf32, #tpu.memory_space<vmem>>, %arg3: memref<1x1x32xf32, #tpu.memory_space<vmem>>, %arg4: memref<32x64xf32, #tpu.memory_space<vmem>>, %arg5: memref<1x64xf32, #tpu.memory_space<vmem>>, %arg6: memref<64x32xf32, #tpu.memory_space<vmem>>, %arg7: memref<1x32xf32, #tpu.memory_space<vmem>>, %arg8: memref<1x8x32xf32, #tpu.memory_space<vmem>>) attributes {dimension_semantics = [#tpu.dimension_semantics<parallel>, #tpu.dimension_semantics<parallel>], iteration_bounds = array<i64: 2, 1>, scalar_prefetch = 0 : i64, scratch_operands = 0 : i64, tpu.core_type = #tpu.core_type<tc>, window_params = [{transform_indices = @transform_0, window_bounds = array<i64: 1, 8, 32>}, {transform_indices = @transform_1, window_bounds = array<i64: 1, 1, 32>}, {pipeline_mode = #tpu.pipeline_mode<synchronous>, transform_indices = @transform_2, window_bounds = array<i64: 32, 64>}, {pipeline_mode = #tpu.pipeline_mode<synchronous>, transform_indices = @transform_3, window_bounds = array<i64: 1, 64>}, {pipeline_mode = #tpu.pipeline_mode<synchronous>, transform_indices = @transform_4, window_bounds = array<i64: 64, 32>}, {pipeline_mode = #tpu.pipeline_mode<synchronous>, transform_indices = @transform_5, window_bounds = array<i64: 1, 32>}, {transform_indices = @transform_6, window_bounds = array<i64: 1, 8, 32>}]} {
    %c0 = arith.constant 0 : index
    %c0_0 = arith.constant 0 : index
    %c0_1 = arith.constant 0 : index
    %0 = vector.load %arg2[%c0, %c0_0, %c0_1] : memref<1x8x32xf32, #tpu.memory_space<vmem>>, vector<1x8x32xf32>
    %1 = vector.shape_cast %0 : vector<1x8x32xf32> to vector<8x32xf32>
    %c0_2 = arith.constant 0 : index
    %c0_3 = arith.constant 0 : index
    %c0_4 = arith.constant 0 : index
    %2 = vector.load %arg3[%c0_2, %c0_3, %c0_4] : memref<1x1x32xf32, #tpu.memory_space<vmem>>, vector<1x1x32xf32>
    %3 = vector.shape_cast %2 : vector<1x1x32xf32> to vector<1x32xf32>
    %4 = vector.broadcast %3 : vector<1x32xf32> to vector<8x32xf32>
    %5 = arith.addf %1, %4 : vector<8x32xf32>
    %c0_5 = arith.constant 0 : index
    %c0_6 = arith.constant 0 : index
    %6 = vector.load %arg4[%c0_5, %c0_6] : memref<32x64xf32, #tpu.memory_space<vmem>>, vector<32x64xf32>
    %cst = arith.constant dense<0.000000e+00> : vector<8x64xf32>
    %7 = tpu.matmul %5, %6, %cst {dimension_numbers = #tpu.dot_dimension_numbers<[1], [0], [0], [1], [0, 0, 1, 1], [], []>} : vector<8x32xf32>, vector<32x64xf32>, vector<8x64xf32> -> vector<8x64xf32>
    %c0_7 = arith.constant 0 : index
    %c0_8 = arith.constant 0 : index
    %8 = vector.load %arg5[%c0_7, %c0_8] : memref<1x64xf32, #tpu.memory_space<vmem>>, vector<1x64xf32>
    %9 = vector.broadcast %8 : vector<1x64xf32> to vector<8x64xf32>
    %10 = arith.addf %7, %9 : vector<8x64xf32>
    %cst_9 = arith.constant 5.000000e-01 : f32
    %11 = vector.broadcast %cst_9 : f32 to vector<8x64xf32>
    %12 = arith.mulf %11, %10 : vector<8x64xf32>
    %cst_10 = arith.constant 0.707106769 : f32
    %13 = vector.broadcast %cst_10 : f32 to vector<8x64xf32>
    %14 = arith.mulf %10, %13 : vector<8x64xf32>
    %15 = math.erf %14 : vector<8x64xf32>
    %cst_11 = arith.constant 1.000000e+00 : f32
    %16 = vector.broadcast %cst_11 : f32 to vector<8x64xf32>
    %17 = arith.addf %16, %15 : vector<8x64xf32>
    %18 = arith.mulf %12, %17 : vector<8x64xf32>
    %c0_12 = arith.constant 0 : index
    %c0_13 = arith.constant 0 : index
    %19 = vector.load %arg6[%c0_12, %c0_13] : memref<64x32xf32, #tpu.memory_space<vmem>>, vector<64x32xf32>
    %cst_14 = arith.constant dense<0.000000e+00> : vector<8x32xf32>
    %20 = tpu.matmul %18, %19, %cst_14 {dimension_numbers = #tpu.dot_dimension_numbers<[1], [0], [0], [1], [0, 0, 1, 1], [], []>} : vector<8x64xf32>, vector<64x32xf32>, vector<8x32xf32> -> vector<8x32xf32>
    %c0_15 = arith.constant 0 : index
    %c0_16 = arith.constant 0 : index
    %21 = vector.load %arg7[%c0_15, %c0_16] : memref<1x32xf32, #tpu.memory_space<vmem>>, vector<1x32xf32>
    %22 = vector.broadcast %21 : vector<1x32xf32> to vector<8x32xf32>
    %23 = arith.addf %20, %22 : vector<8x32xf32>
    %24 = arith.addf %23, %1 : vector<8x32xf32>
    %c0_17 = arith.constant 0 : index
    %c0_18 = arith.constant 0 : index
    %c0_19 = arith.constant 0 : index
    %25 = vector.load %arg8[%c0_17, %c0_18, %c0_19] : memref<1x8x32xf32, #tpu.memory_space<vmem>>, vector<1x8x32xf32>
    %26 = vector.shape_cast %25 : vector<1x8x32xf32> to vector<8x32xf32>
    %27 = vector.shape_cast %24 : vector<8x32xf32> to vector<1x8x32xf32>
    tpu.vector_store %arg8[%c0_17, %c0_18, %c0_19], %27 {strides = array<i32>} : memref<1x8x32xf32, #tpu.memory_space<vmem>>, vector<1x8x32xf32>,
    return
  }
  func.func @transform_0(%arg0: i32, %arg1: i32) -> (i32, i32, i32) {
    %c0_i32 = arith.constant 0 : i32
    %c0_i32_0 = arith.constant 0 : i32
    return %arg0, %arg1, %c0_i32 : i32, i32, i32
  }
  func.func @transform_1(%arg0: i32, %arg1: i32) -> (i32, i32, i32) {
    %c0_i32 = arith.constant 0 : i32
    %c0_i32_0 = arith.constant 0 : i32
    %c0_i32_1 = arith.constant 0 : i32
    return %arg0, %c0_i32, %c0_i32_0 : i32, i32, i32
  }
  func.func @transform_2(%arg0: i32, %arg1: i32) -> (i32, i32) {
    %c0_i32 = arith.constant 0 : i32
    %c0_i32_0 = arith.constant 0 : i32
    %c0_i32_1 = arith.constant 0 : i32
    return %c0_i32, %c0_i32_0 : i32, i32
  }
  func.func @transform_3(%arg0: i32, %arg1: i32) -> (i32, i32) {
    %c0_i32 = arith.constant 0 : i32
    %c0_i32_0 = arith.constant 0 : i32
    %c0_i32_1 = arith.constant 0 : i32
    return %c0_i32, %c0_i32_0 : i32, i32
  }
  func.func @transform_4(%arg0: i32, %arg1: i32) -> (i32, i32) {
    %c0_i32 = arith.constant 0 : i32
    %c0_i32_0 = arith.constant 0 : i32
    %c0_i32_1 = arith.constant 0 : i32
    return %c0_i32, %c0_i32_0 : i32, i32
  }
  func.func @transform_5(%arg0: i32, %arg1: i32) -> (i32, i32) {
    %c0_i32 = arith.constant 0 : i32
    %c0_i32_0 = arith.constant 0 : i32
    %c0_i32_1 = arith.constant 0 : i32
    return %c0_i32, %c0_i32_0 : i32, i32
  }
  func.func @transform_6(%arg0: i32, %arg1: i32) -> (i32, i32, i32) {
    %c0_i32 = arith.constant 0 : i32
    %c0_i32_0 = arith.constant 0 : i32
    return %arg0, %arg1, %c0_i32 : i32, i32, i32
  }
}

</mosaic_0001>

<bundles_post_ra>
// kernel: block_forward.3
= control target key start
LH: loop header
LB: loop body
LE: loop exit
PB: predicated region body
PF: predicated region fallthrough
CT: control target
= control target key end

     0   :  { %11 = vsyncpa [#allocation3], 0  ;;  %s952_s0 = inlined_call_operand.vmem [shape: f32[2,8,32], index: 0, kind: input, shape index: {}]   ;;  %s953_s1 = inlined_call_operand.vmem [shape: f32[2,1,32], index: 1, kind: input, shape index: {}]   ;;  %s954_s2 = inlined_call_operand.vmem [shape: f32[32,64], index: 2, kind: input, shape index: {}]   ;;  %s955_s3 = inlined_call_operand.vmem [shape: f32[1,64], index: 3, kind: input, shape index: {}]   ;;  %s956_s4 = inlined_call_operand.vmem [shape: f32[64,32], index: 4, kind: input, shape index: {}]   ;;  %s957_s5 = inlined_call_operand.vmem [shape: f32[1,32], index: 5, kind: input, shape index: {}]   ;;  %s958_s6 = inlined_call_operand.hbm [shape: f32[2,8,32], index: 6, kind: output, shape index: {}]  }
   0x1   :  { %13 = vsyncpa [#allocation3 + $0x1], 0  ;;  %s806_s21 = smov 0   ;;  %s808_s22 = smov 0  }
   0x2   :  { %s810_s23 = smov 0   ;;  %s812_s24 = smov 0  }
   0x3   :  { %s814_s25 = smov 0   ;;  %s816_s26 = smov 0  }
   0x4 LB: > { %s571_s27 = sadd.s32 4294967295, %s766_s26   ;;  %s572_s28 = sadd.s32 4294967294, %s766_s26   ;;  %s766_s26 = sphi %s816_s26, %s19_s26   ;;  %s762_s25 = sphi %s814_s25, %s965_s25   ;;  %s758_s24 = sphi %s812_s24, %s964_s24   ;;  %s754_s23 = sphi %s810_s23, %s963_s23   ;;  %s750_s22 = sphi %s808_s22, %s962_s22   ;;  %s746_s21 = sphi %s806_s21, %s961_s21  }
   0x5   : > { %s31_s29 = sadd.s32 1, %s762_s25  ;;  %s178_s30 = sadd.s32 1, %s754_s23 }
   0x6   : > { %p33_p0 = scmp.ge.s32.totalorder %s31_s29, 2  ;;  %p188_p1 = scmp.ne.s32.totalorder %s754_s23, %s750_s22 }
   0x7   : > { %p189_p2 = scmp.eq.s32.totalorder %s571_s27, 1  ;;  %p194_p3 = scmp.ne.s32.totalorder %s750_s22, %s746_s21 }
   0x8   : > { %s967_s29 = smov (%p33_p0, %s31_s29), 0  ;;  %p195_p5 = scmp.eq.s32.totalorder %s572_s28, 1 }
   0x9   : > { %p846_p4 = por %p189_p2, %p188_p1  ;;  %s173_s8 = ssub.s32 %s762_s25, %s967_s29 }
   0xa   : > { %p575_p6 = scmp.ge.s32.totalorder %s766_s26, 1  ;;  %p176_p7 = scmp.eq.s32.totalorder %s173_s8, 0 }
   0xb   : > { %p853_p8 = por %p195_p5, %p194_p3  ;;  %p241_p9 = scmp.lt.s32.totalorder %s766_s26, 3 }
   0xc   : > { %s859_s10 = scalar_select %p176_p7, %s754_s23, %s178_s30  }
   0xd   : > { %p242_p10 = pnand %p575_p6, %p241_p9 }
   0xe   : > { %p276_p11 = scmp.lt.s32.totalorder (!%p242_p10), %s758_s24, 1  ;;  %s273_s17 = sand.u32 (!%p242_p10), 1, %s750_s22  }
   0xf   : > { %245 = sbr.rel (%p242_p10) target bundleno = 454 (0x1c6), region = 44  ;;  %s477_s13 = scalar_lea.sflag (!%p242_p10), [#allocation3], %s273_s17 }
  0x14   : > { %v298_v0 = vld [vmem:[%s954_s2 + $0x18] sm:$0xff]  ;;  %v768_v1 = vmov 0.0   ;;  %v297_v2 = vld [vmem:[%s954_s2 + $0x10] sm:$0xff]  ;;  %vm769_vm0 = vmmov 0   ;;  %s277_s15 = scalar_select %p276_p11, %s758_s24, 1  ;;  %v296_v3 = vld [vmem:[%s954_s2 + $0x8] sm:$0xff] }
  0x15   : > { %601 = vmatprep.subr.mxu0 %v768_v1  ;;  %609 = vmatprep.mubr.msk.f32.mxu0 %vm769_vm0, %v768_v1  ;;  %v295_v4 = vld [vmem:[%s954_s2] sm:$0xff]  ;;  %vm306_vm1 = vcmask 261120   ;;  %v392_v8 = vld [vmem:[%s956_s4 + $0x38] sm:$0xff]  ;;  %v391_v9 = vld [vmem:[%s956_s4 + $0x30] sm:$0xff]  ;;  %vm400_vm2 = vcmask 523264  }
  0x16   : > { %602 = vmatpush3.msra.mxu0 %v298_v0  ;;  %612 = vmatprep.subr.mxu1 %v768_v1  ;;  %s577_s18 = sshll.u32 %s277_s15, 3  ;;  %s285_s27 = scalar_lea.vmem %s953_s1, %s277_s15  ;;  %v390_v10 = vld [vmem:[%s956_s4 + $0x28] sm:$0xff]  ;;  %v389_v11 = vld [vmem:[%s956_s4 + $0x20] sm:$0xff]  ;;  %v388_v12 = vld [vmem:[%s956_s4 + $0x18] sm:$0xff] }
  0x17   : > { %603 = vmatprep.subr.mxu0 %v768_v1  ;;  %628 = vmatprep.mubr.msk.f32.mxu1 %vm769_vm0, %v768_v1  ;;  %s282_s12 = scalar_lea.vmem %s952_s0, %s577_s18  ;;  %v578_v5 = vld [vmem:[%s285_s27] ss:$0 sm:$0xff]  ;;  %v387_v13 = vld [vmem:[%s956_s4 + $0x10] sm:$0xff]  ;;  %v386_v14 = vld [vmem:[%s956_s4 + $0x8] sm:$0xff]  ;;  %s576_s18 = sshll.u32 %s273_s17, 3 }
  0x18   : > { %604 = vmatpush3.msra.mxu0 %v297_v2  ;;  %v286_v6 = vld [vmem:[%s282_s12] sm:$0xff]  ;;  %613 = vmatpush3.msra.mxu1 %v392_v8  ;;  %s584_s27 = sshll.u32 %s758_s24, 7  ;;  %s275_s28 = scalar_lea.vmem [#allocation2], %s576_s18 }
  0x19   : > { %605 = vmatprep.subr.mxu0 %v768_v1  ;;  %v294_v7 = vadd.f32 %v578_v5, %v286_v6  ;;  %614 = vmatprep.subr.mxu1 %v768_v1  ;;  %v385_v15 = vld [vmem:[%s956_s4] sm:$0xff]  ;;  %s491_s30 = sshll.u32 %s275_s28, 4  ;;  %s489_s12 = scalar_lea.hbm %s958_s6, %s584_s27  ;;  %s492_s30 = int_to_ptr.vmem [resolvable:$true] %s491_s30 }
  0x1a   : > { %606 = vmatpush3.msra.mxu0 %v296_v3  ;;  %615 = vmatpush3.msra.mxu1 %v391_v9  ;;  %v579_v16 = vld [vmem:[%s955_s3] ss:$0 sm:$0xff]  ;;  %s690_s14 = scalar_lea.vmem %s492_s30, 128  ;;  %s770_s15 = smov [#allocation2]  }
  0x1b   : > { %607 = vmatprep.subr.mxu0 %v768_v1  ;;  %616 = vmatprep.subr.mxu1 %v768_v1  ;;  %v581_v25 = vld [vmem:[%s957_s5] ss:$0 sm:$0xff]  ;;  %p691_p12 = scmp.ne.s32.totalorder %s492_s30, %s690_s14  ;;  %s694_s24 = sshll.u32 %s770_s15, 4  ;;  %s695_s24 = int_to_ptr.vmem [resolvable:$false] %s694_s24 }
  0x1c   : > { %608 = vmatpush3.msra.mxu0 %v295_v4  ;;  %617 = vmatpush3.msra.mxu1 %v390_v10  ;;  %s696_s16 = scalar_lea.vmem %s695_s24, 256  ;;  %p697_p1 = scmp.lt.s32.totalorder %s492_s30, %s695_s24 }
  0x1d   : > { %610 = vmatmul.mubr.msk.f32.vlgmr.msra.gmra.mxu0 %vm306_vm1, %v294_v7  ;;  %618 = vmatprep.subr.mxu1 %v768_v1  ;;  %p692_p13 = pnand %p691_p12, %p846_p4  ;;  %p698_p2 = scmp.lt.s32.totalorder %s696_s16, %s690_s14 }
  0x1e   : > { %619 = vmatpush3.msra.mxu1 %v389_v11 }
  0x1f   : > { %620 = vmatprep.subr.mxu1 %v768_v1  ;;  %p693_p0 = pneg %p692_p13  ;;  %p699_p3 = por %p698_p2, %p697_p1 }
  0x20   : > { %621 = vmatpush3.msra.mxu1 %v388_v12 }
  0x21   : > { %622 = vmatprep.subr.mxu1 %v768_v1  ;;  %p700_p5 = pnand %p699_p3, %p693_p0 }
  0x22   : > { %623 = vmatpush3.msra.mxu1 %v387_v13 }
  0x23   : > { %624 = vmatprep.subr.mxu1 %v768_v1 }
  0x24   : > { %625 = vmatpush3.msra.mxu1 %v386_v14 }
  0x25   : > { %626 = vmatprep.subr.mxu1 %v768_v1 }
  0x26   : > { %627 = vmatpush3.msra.mxu1 %v385_v15 }
  0xdd   : > { %v376_v17 = vpop.f32.mrf.mxu0 }
  0xde   : > { %v377_v18 = vadd.f32 %v579_v16, %v376_v17 }
  0xdf   : > { %v611_v19 = vpop.f32.mrf.mxu0 }
  0xe0   : > { %v381_v20 = vmul.f32 0.70710677, %v377_v18  ;;  %v380_v22 = vmul.f32 0.5, %v377_v18 }
  0xe2   : > { %688 = verf.f32 %v381_v20 }
  0xef   : > { %v689_v21 = vpop.eup %688 }
  0xf0   : > { %v383_v23 = vadd.f32 1.0, %v689_v21 }
  0xf2   : > { %v384_v24 = vmul.f32 %v383_v23, %v380_v22 }
  0xf4   : > { %629 = vmatmul.mubr.msk.f32.vlgmr.msra.gmra.mxu1 %vm400_vm2, %v384_v24 }
 0x1b4   : > { %v470_v26 = vpop.f32.mrf.mxu1 }
 0x1b5   : > { %v471_v27 = vadd.f32 %v581_v25, %v470_v26 }
 0x1b6   : > { %v630_v28 = vpop.f32.mrf.mxu1 }
 0x1b7   : > { %v474_v29 = vadd.f32 %v471_v27, %v286_v6 }
 0x1b9   : > { %475 = vst.msk [vmem:[%s275_s28] sm:$0xff] %vm306_vm1, %v474_v29 }
 0x1ba   : > { %703 = shalt.err (!%p700_p5)
}
 0x1bb   : > { %s704_s18 = scalar_lea.hbm %s489_s12, 128  ;;  %s708_s20 = scalar_lea.hbm %s958_s6, 256 }
 0x1bc   : > { %p705_p6 = scmp.ne.s32.totalorder %s489_s12, %s704_s18  ;;  %p709_p10 = scmp.lt.s32.totalorder %s489_s12, %s958_s6 }
 0x1bd   : > { %p710_p11 = scmp.lt.s32.totalorder %s708_s20, %s704_s18 }
 0x1be   : > { %p706_p7 = pnand %p705_p6, %p846_p4 }
 0x1bf   : > { %p711_p12 = por %p710_p11, %p709_p10 }
 0x1c0   : > { %p707_p9 = pneg %p706_p7 }
 0x1c2   : > { %p712_p13 = pnand %p711_p12, %p707_p9 }
 0x1c4   : > { %715 = shalt.err (!%p712_p13)
}
 0x1c5   : > { %631 = dma.vmem_to_hbm [thread:$0]  (%p846_p4), %s492_s30, 128, %s489_s12, %s477_s13  }
 0x1c6 PF: > { %p637_p0 = scmp.ge.s32.totalorder %s766_s26, 2  ;;  %s503_s8 = sand.u32 1, %s746_s21  }
 0x1c7   : > { %s504_s11 = scalar_lea.sflag [#allocation3], %s503_s8 }
 0x1c8   : > { %p634_p1 = pnand %p637_p0, %p853_p8 }
 0x1ca   : > { %p635_p2 = pneg %p634_p1 }
 0x1cc   : > { %741 = dma.done.wait (%p635_p2), %s504_s11, 128  }
 0x1cd   : > { %743 = vsyncadd (%p635_p2), %s504_s11, 4294967168  ;;  %s19_s26 = sadd.s32 1, %s766_s26   ;;  %s961_s21 = smov %s750_s22 }
 0x1ce   : > { %p16_p3 = scmp.ge.s32.totalorder %s19_s26, 4   ;;  %s962_s22 = smov %s754_s23 }
 0x1cf   : > { %s963_s23 = smov %s859_s10  ;;  %s964_s24 = smov %s762_s25 }
 0x1d0   : > { %s965_s25 = smov %s967_s29  ;;  %18 = sbr.rel (!%p16_p3) target bundleno = 4 (0x4), region = 82 }
 0x1d5   :  { %509 = vsyncpa [#allocation3], 1 }
 0x1d6   :  { %511 = vsyncpa [#allocation3 + $0x1], 1 }

// kernel: block_forward.2
= control target key start
LH: loop header
LB: loop body
LE: loop exit
PB: predicated region body
PF: predicated region fallthrough
CT: control target
= control target key end

     0   :  { %s1440_s18 = smov 0   ;;  %s1622_s0 = inlined_call_operand.vmem [shape: f32[2,8,32], index: 0, kind: input, shape index: {}]   ;;  %s1623_s1 = inlined_call_operand.vmem [shape: f32[2,1,32], index: 1, kind: input, shape index: {}]   ;;  %s1624_s2 = inlined_call_operand.vmem [shape: f32[2,8,1], index: 2, kind: input, shape index: {}]   ;;  %s1625_s3 = inlined_call_operand.vmem [shape: f32[32,32], index: 3, kind: input, shape index: {}]   ;;  %s1626_s4 = inlined_call_operand.vmem [shape: f32[1,32], index: 4, kind: input, shape index: {}]   ;;  %s1627_s5 = inlined_call_operand.vmem [shape: f32[32,64], index: 5, kind: input, shape index: {}]   ;;  %s1628_s6 = inlined_call_operand.vmem [shape: f32[1,64], index: 6, kind: input, shape index: {}]   ;;  %s1629_s7 = inlined_call_operand.vmem [shape: f32[32,32], index: 7, kind: input, shape index: {}]   ;;  %s1630_s8 = inlined_call_operand.vmem [shape: f32[1,32], index: 8, kind: input, shape index: {}]   ;;  %s1631_s9 = inlined_call_operand.vmem [shape: f32[32,64], index: 9, kind: input, shape index: {}]   ;;  %s1632_s10 = inlined_call_operand.vmem [shape: f32[1,64], index: 10, kind: input, shape index: {}]   ;;  %s1633_s11 = inlined_call_operand.vmem [shape: f32[64,32], index: 11, kind: input, shape index: {}]   ;;  %s1634_s12 = inlined_call_operand.vmem [shape: f32[1,32], index: 12, kind: input, shape index: {}]   ;;  %s1635_s13 = inlined_call_operand.vmem [shape: f32[32,4], index: 13, kind: input, shape index: {}]   ;;  %s1636_s14 = inlined_call_operand.vmem [shape: f32[4,32], index: 14, kind: input, shape index: {}]   ;;  %s1637_s15 = inlined_call_operand.vmem [shape: f32[2,1,32], index: 15, kind: output, shape index: {}]  }
   0x1 LB: > { %s1196_s19 = sadd.s32 4294967295, %s1354_s18   ;;  %p1200_p0 = scmp.ge.s32.totalorder %s1354_s18, 1  ;;  %s1354_s18 = sphi %s1440_s18, %s25_s18  }
   0x2   : > { %p453_p1 = scmp.lt.s32.totalorder %s1354_s18, 3 }
   0x4   : > { %p454_p2 = pnand %p1200_p0, %p453_p1 }
   0x5   : > { %p505_p3 = scmp.lt.s32.totalorder (!%p454_p2), %s1196_s19, 1  ;;  %s1359_s20 = smov (!%p454_p2), 96  }
   0x6   : > { %457 = sbr.rel (%p454_p2) target bundleno = 1294 (0x50e), region = 80 }
   0xb   : > { %v524_v0 = vld [vmem:[%s1625_s3 + $0x18] sm:$0xff]  ;;  %v1356_v1 = vmov 0.0   ;;  %v523_v2 = vld [vmem:[%s1625_s3 + $0x10] sm:$0xff]  ;;  %vm1357_vm0 = vmmov 0   ;;  %s1639_s19 = smov (!%p505_p3, %s1196_s19), 1  ;;  %v1358_v3 = vmov 0   ;;  %v684_v17 = vlaneseq }
   0xc   : > { %1250 = vmatprep.subr.mxu0 %v1356_v1  ;;  %1258 = vmatprep.mubr.msk.f32.mxu0 %vm1357_vm0, %v1356_v1  ;;  %v522_v4 = vld [vmem:[%s1625_s3 + $0x8] sm:$0xff]  ;;  %s511_s28 = scalar_lea.vmem %s1623_s1, %s1639_s19  ;;  %s1201_s29 = sshll.u32 %s1639_s19, 3  ;;  %v521_v5 = vld [vmem:[%s1625_s3] sm:$0xff]  ;;  %vm526_vm1 = vcmask 261120   ;;  %v603_v8 = vld [vmem:[%s1627_s5 + $0x18] sm:$0xff]  ;;  %vm796_vm2 = vcmask 1043456  }
   0xd   : > { %1251 = vmatpush3.msra.mxu0 %v524_v0  ;;  %1341 = vset.pattern.permute.xlu0 %v1358_v3  ;;  %s515_s21 = scalar_lea.vmem %s1624_s2, %s1201_s29  ;;  %v520_v6 = vld [vmem:[%s511_s28] sm:$0x1]  ;;  %v602_v9 = vld [vmem:[%s1627_s5 + $0x10] sm:$0xff]  ;;  %v601_v10 = vld [vmem:[%s1627_s5 + $0x8] sm:$0xff]  ;;  %s508_s16 = scalar_lea.vmem %s1622_s0, %s1201_s29  ;;  %v685_v19 = vshrl.u32 %v684_v17, 7  ;;  %vm772_vm3 = vcmask 31744  }
   0xe   : > { %1252 = vmatprep.subr.mxu0 %v1356_v1  ;;  %1283 = vmatprep.subr.mxu1 %v1356_v1  ;;  %v693_v7 = vld [vmem:[%s515_s21] sm:$0xff]  ;;  %v692_v13 = vld [vmem:[%s1635_s13 + $0x18] sm:$0xff]  ;;  %v691_v14 = vld [vmem:[%s1635_s13 + $0x10] sm:$0xff]  ;;  %vm1052_vm4 = vcmask 523264   ;;  %s518_s23 = scalar_lea.vmem %s1637_s15, %s1639_s19  ;;  %vm1126_vm5 = vcmask 253952  }
   0xf   : > { %1253 = vmatpush3.msra.mxu0 %v523_v2  ;;  %1285 = vmatprep.mubr.msk.f32.mxu1 %vm1357_vm0, %v1356_v1  ;;  %v600_v11 = vld [vmem:[%s1627_s5] sm:$0xff]  ;;  %v690_v15 = vld [vmem:[%s1635_s13 + $0x8] sm:$0xff]  ;;  %v686_v23 = vsub.s32 0, %v685_v19  ;;  %v885_v54 = vld [vmem:[%s1629_s7 + $0x18] sm:$0xff] }
  0x10   : > { %1254 = vmatprep.subr.mxu0 %v1356_v1  ;;  %696 = vperm.xlu0 %1341, %v693_v7   ;;  %v519_v12 = vld [vmem:[%s508_s16] sm:$0xff]  ;;  %v884_v55 = vld [vmem:[%s1629_s7 + $0x10] sm:$0xff]  ;;  %v883_v56 = vld [vmem:[%s1629_s7 + $0x8] sm:$0xff] }
  0x11   : > { %1255 = vmatpush3.msra.mxu0 %v522_v4  ;;  %v689_v16 = vld [vmem:[%s1635_s13] sm:$0xff]  ;;  %v963_v58 = vld [vmem:[%s1631_s9 + $0x18] sm:$0xff]  ;;  %v962_v59 = vld [vmem:[%s1631_s9 + $0x10] sm:$0xff] }
  0x12   : > { %1256 = vmatprep.subr.mxu0 %v1356_v1  ;;  %v525_v20 = vld [vmem:[%s1626_s4] sm:$0x1]  ;;  %v1045_v19 = vld [vmem:[%s1633_s11 + $0x10] sm:$0xff] }
  0x13   : > { %1257 = vmatpush3.msra.mxu0 %v521_v5  ;;  %v1204_v24 = vld [vmem:[%s1628_s6] ss:$0 sm:$0xff] }
  0x14   : > { %1259 = vmatmul.mubr.msk.f32.vlgmr.msra.gmra.mxu0 %vm526_vm1, %v520_v6  ;;  %1261 = vmatprep.subr.mxu0 %v1356_v1  ;;  %v792_v30 = vld [vmem:[%s1636_s14] sm:$0xf] }
  0x15   : > { %1262 = vmatpush3.msra.mxu0 %v603_v8  ;;  %1269 = vmatprep.mubr.msk.f32.mxu0 %vm1357_vm0, %v1356_v1  ;;  %v882_v57 = vld [vmem:[%s1629_s7] sm:$0xff]  ;;  %v961_v8 = vld [vmem:[%s1631_s9 + $0x8] sm:$0xff] }
  0x16   : > { %1263 = vmatprep.subr.mxu0 %v1356_v1  ;;  %1284 = vmatpush3.msk.msra.mxu1 %vm796_vm2, %v792_v30  ;;  %v1047_v17 = vld [vmem:[%s1633_s11 + $0x20] sm:$0xff] }
  0x17   : > { %1264 = vmatpush3.msra.mxu0 %v602_v9  ;;  %1288 = vmatprep.subr.mxu1 %v1356_v1  ;;  %v960_v9 = vld [vmem:[%s1631_s9] sm:$0xff] }
  0x18   : > { %1265 = vmatprep.subr.mxu0 %v1356_v1  ;;  %v1051_v30 = vld [vmem:[%s1634_s12] sm:$0x1] }
  0x19   : > { %1266 = vmatpush3.msra.mxu0 %v601_v10  ;;  %v886_v10 = vld [vmem:[%s1630_s8] sm:$0x1] }
  0x1a   : > { %1267 = vmatprep.subr.mxu0 %v1356_v1 }
  0x1b   : > { %1268 = vmatpush3.msra.mxu0 %v600_v11 }
  0x1c   : > { %1270 = vmatmul.mubr.msk.f32.vlgmr.msra.gmra.mxu0 %vm526_vm1, %v519_v12  ;;  %1272 = vmatprep.subr.mxu0 %v1356_v1 }
  0x1d   : > { %1280 = vmatprep.mubr.msk.f32.mxu0 %vm1357_vm0, %v1356_v1  ;;  %1273 = vmatpush3.msra.mxu0 %v692_v13 }
  0x1e   : > { %1274 = vmatprep.subr.mxu0 %v1356_v1 }
  0x1f   : > { %1275 = vmatpush3.msra.mxu0 %v691_v14  ;;  %v1050_v14 = vld [vmem:[%s1633_s11 + $0x38] sm:$0xff] }
  0x20   : > { %1276 = vmatprep.subr.mxu0 %v1356_v1 }
  0x21   : > { %1277 = vmatpush3.msra.mxu0 %v690_v15  ;;  %v1049_v15 = vld [vmem:[%s1633_s11 + $0x30] sm:$0xff] }
  0x22   : > { %1278 = vmatprep.subr.mxu0 %v1356_v1 }
  0x23   : > { %1279 = vmatpush3.msra.mxu0 %v689_v16  ;;  %v1048_v16 = vld [vmem:[%s1633_s11 + $0x28] sm:$0xff] }
  0x24   : > { %1299 = vmatprep.subr.mxu0 %v1356_v1 }
  0x8b   : > { %v697_v31 = vpop.permute.xlu0 %696 }
  0xd4   : > { %v596_v18 = vpop.f32.mrf.mxu0 }
  0xd5   : > { %v597_v22 = vadd.f32 %v596_v18, %v525_v20  ;;  %v1046_v18 = vld [vmem:[%s1633_s11 + $0x18] sm:$0xff]  ;;  %v1044_v20 = vld [vmem:[%s1633_s11 + $0x8] sm:$0xff] }
  0xd6   : > { %v1260_v21 = vpop.f32.mrf.mxu0 }
  0xd7   : > { %v687_v26 = vrot.slane %v597_v22, %v686_v23  ;;  %v1043_v21 = vld [vmem:[%s1633_s11] sm:$0xff] }
  0xd8   : > { %v964_v22 = vld [vmem:[%s1632_s10] sm:$0x1] }
  0xdc   : > { %v680_v25 = vpop.f32.mrf.mxu0 }
  0xdd   : > { %v681_v27 = vadd.f32 %v1204_v24, %v680_v25 }
  0xde   : > { %v1271_v28 = vpop.f32.mrf.mxu0 }
  0xdf   : > { %v688_v29 = vmul.f32 %v687_v26, %v681_v27  ;;  %871 = vrot.lane.b32.xlu0 %v681_v27, %s1359_s20 }
  0xe1   : > { %1281 = vmatmul.mubr.msk.f32.vlgmr.msra.gmra.mxu0 %vm526_vm1, %v688_v29 }
  0xe2   : > { %1307 = vmatprep.mubr.msk.f32.mxu0 %vm1357_vm0, %v1356_v1  ;;  %1300 = vmatpush3.msra.mxu0 %v963_v58 }
  0xe3   : > { %1301 = vmatprep.subr.mxu0 %v1356_v1 }
  0xe4   : > { %1302 = vmatpush3.msra.mxu0 %v962_v59 }
  0xe5   : > { %1303 = vmatprep.subr.mxu0 %v1356_v1 }
  0xe6   : > { %1304 = vmatpush3.msra.mxu0 %v961_v8 }
  0xe7   : > { %1305 = vmatprep.subr.mxu0 %v1356_v1 }
  0xe8   : > { %1306 = vmatpush3.msra.mxu0 %v960_v9 }
 0x151   : > { %v872_v60 = vpop.permute.xlu0 %871 }
 0x1a1   : > { %v768_v32 = vpop.f32.mrf.mxu0 }
 0x1a2   : > { %v769_v33 = vadd.f32 %v768_v32, %v697_v31 }
 0x1a3   : > { %v1282_v34 = vpop.f32.mrf.mxu0 }
 0x1a4   : > { %v773_v35 = vsel %vm772_vm3, %v769_v33, -inf }
 0x1a5   : > { %v774_v36 = vrot.slane %v773_v35, 4 }
 0x1a7   : > { %v775_v37 = vmax.f32 %v773_v35, %v774_v36 }
 0x1a9   : > { %v776_v38 = vrot.slane %v775_v37, 2 }
 0x1ab   : > { %v777_v39 = vmax.f32 %v775_v37, %v776_v38 }
 0x1ad   : > { %v778_v40 = vrot.slane %v777_v39, 1 }
 0x1af   : > { %v779_v41 = vmax.f32 %v777_v39, %v778_v40 }
 0x1b1   : > { %v780_v42 = vsub.f32 %v769_v33, %v779_v41 }
 0x1b3   : > { %v781_v43 = vmul.f32 1.442695, %v780_v42 }
 0x1b5   : > { %1342 = vpow2.f32 %v781_v43 }
 0x1c2   : > { %v1343_v44 = vpop.eup %1342 }
 0x1c3   : > { %v783_v45 = vsel %vm772_vm3, %v1343_v44, 0.0 }
 0x1c4   : > { %v784_v46 = vrot.slane %v783_v45, 4 }
 0x1c6   : > { %v785_v47 = vadd.f32 %v784_v46, %v783_v45 }
 0x1c8   : > { %v786_v48 = vrot.slane %v785_v47, 2 }
 0x1ca   : > { %v787_v49 = vadd.f32 %v786_v48, %v785_v47 }
 0x1cc   : > { %v788_v50 = vrot.slane %v787_v49, 1 }
 0x1ce   : > { %v789_v51 = vadd.f32 %v788_v50, %v787_v49 }
 0x1d0   : > { %1344 = vrcp.f32 %v789_v51 }
 0x1dd   : > { %v1345_v52 = vpop.eup %1344 }
 0x1de   : > { %v791_v53 = vmul.f32 %v1345_v52, %v1343_v44 }
 0x1e0   : > { %1286 = vmatmul.mubr.msk.f32.vlgmr.msra.gmra.mxu1 %vm772_vm3, %v791_v53 }
 0x1e1   : > { %1296 = vmatprep.mubr.msk.f32.mxu1 %vm1357_vm0, %v1356_v1  ;;  %1289 = vmatpush3.msra.mxu1 %v885_v54 }
 0x1e2   : > { %1290 = vmatprep.subr.mxu1 %v1356_v1 }
 0x1e3   : > { %1291 = vmatpush3.msra.mxu1 %v884_v55 }
 0x1e4   : > { %1292 = vmatprep.subr.mxu1 %v1356_v1 }
 0x1e5   : > { %1293 = vmatpush3.msra.mxu1 %v883_v56 }
 0x1e6   : > { %1294 = vmatprep.subr.mxu1 %v1356_v1 }
 0x1e7   : > { %1295 = vmatpush3.msra.mxu1 %v882_v57 }
 0x1e8   : > { %1310 = vmatprep.subr.mxu1 %v1356_v1 }
 0x2a0   : > { %v866_v61 = vpop.f32.mrf.mxu1 }
 0x2a1   : > { %v874_v62 = vmul.f32 %v872_v60, %v866_v61 }
 0x2a2   : > { %v1287_v63 = vpop.f32.mrf.mxu1 }
 0x2a3   : > { %v875_v0 = vsel %vm526_vm1, %v874_v62, 0.0 }
 0x2a4   : > { %v876_v2 = vrot.slane %v875_v0, 4 }
 0x2a6   : > { %v877_v3 = vadd.f32 %v876_v2, %v875_v0 }
 0x2a8   : > { %v878_v4 = vrot.slane %v877_v3, 2 }
 0x2aa   : > { %v879_v5 = vadd.f32 %v878_v4, %v877_v3 }
 0x2ac   : > { %v880_v6 = vrot.slane %v879_v5, 1 }
 0x2ae   : > { %v881_v7 = vadd.f32 %v880_v6, %v879_v5 }
 0x2b0   : > { %1297 = vmatmul.mubr.msk.f32.vlgmr.msra.gmra.mxu1 %vm526_vm1, %v881_v7 }
 0x2b1   : > { %1326 = vmatprep.mubr.msk.f32.mxu1 %vm1357_vm0, %v1356_v1  ;;  %1311 = vmatpush3.msra.mxu1 %v1050_v14 }
 0x2b2   : > { %1312 = vmatprep.subr.mxu1 %v1356_v1 }
 0x2b3   : > { %1313 = vmatpush3.msra.mxu1 %v1049_v15 }
 0x2b4   : > { %1314 = vmatprep.subr.mxu1 %v1356_v1 }
 0x2b5   : > { %1315 = vmatpush3.msra.mxu1 %v1048_v16 }
 0x2b6   : > { %1316 = vmatprep.subr.mxu1 %v1356_v1 }
 0x2b7   : > { %1317 = vmatpush3.msra.mxu1 %v1047_v17 }
 0x2b8   : > { %1318 = vmatprep.subr.mxu1 %v1356_v1 }
 0x2b9   : > { %1319 = vmatpush3.msra.mxu1 %v1046_v18 }
 0x2ba   : > { %1320 = vmatprep.subr.mxu1 %v1356_v1 }
 0x2bb   : > { %1321 = vmatpush3.msra.mxu1 %v1045_v19 }
 0x2bc   : > { %1322 = vmatprep.subr.mxu1 %v1356_v1 }
 0x2bd   : > { %1323 = vmatpush3.msra.mxu1 %v1044_v20 }
 0x2be   : > { %1324 = vmatprep.subr.mxu1 %v1356_v1 }
 0x2bf   : > { %1325 = vmatpush3.msra.mxu1 %v1043_v21 }
 0x370   : > { %v956_v11 = vpop.f32.mrf.mxu1 }
 0x371   : > { %v957_v12 = vadd.f32 %v956_v11, %v886_v10 }
 0x372   : > { %v1298_v13 = vpop.f32.mrf.mxu1 }
 0x373   : > { %1308 = vmatmul.mubr.msk.f32.vlgmr.msra.gmra.mxu0 %vm526_vm1, %v957_v12 }
 0x433   : > { %v1034_v23 = vpop.f32.mrf.mxu0 }
 0x434   : > { %v1035_v24 = vadd.f32 %v1034_v23, %v964_v22 }
 0x435   : > { %v1309_v25 = vpop.f32.mrf.mxu0 }
 0x436   : > { %v1039_v26 = vmul.f32 0.70710677, %v1035_v24  ;;  %v1038_v28 = vmul.f32 0.5, %v1035_v24 }
 0x438   : > { %1346 = verf.f32 %v1039_v26 }
 0x445   : > { %v1347_v27 = vpop.eup %1346 }
 0x446   : > { %v1041_v29 = vadd.f32 1.0, %v1347_v27 }
 0x448   : > { %v1042_v1 = vmul.f32 %v1041_v29, %v1038_v28 }
 0x44a   : > { %1327 = vmatmul.mubr.msk.f32.vlgmr.msra.gmra.mxu1 %vm1052_vm4, %v1042_v1 }
 0x50a   : > { %v1122_v31 = vpop.f32.mrf.mxu1 }
 0x50b   : > { %v1123_v32 = vadd.f32 %v1122_v31, %v1051_v30 }
 0x50c   : > { %v1328_v33 = vpop.f32.mrf.mxu1 }
 0x50d   : > { %1127 = vst.msk [vmem:[%s518_s23] sm:$0x1] %vm1126_vm5, %v1123_v32 }
 0x50e PF: > { %s25_s18 = sadd.s32 1, %s1354_s18  }
 0x50f   : > { %p22_p4 = scmp.ge.s32.totalorder %s25_s18, 4  }
 0x511   :  { %24 = sbr.rel (!%p22_p4) target bundleno = 1 (0x1), region = 116 }

</bundles_post_ra>
